<compile_context>
chip_gen: v5e
topology: v5e:2x2
jax: 0.10.0
libtpu: 0.0.40
codegen_flags: <defaults>
</compile_context>

<pallas_src>
import jax
import jax.numpy as jnp
from jax.experimental import pallas as pl
from jax.experimental.pallas import tpu as pltpu


def _linear_hsig_kernel(x_ref, wb_ref, o_ref):
    """x_ref: (B, K) f32 in SMEM (scalar reads);
    wb_ref: (K+1, N) f32 in VMEM — rows 0..K-1 are W^T, row K is bias + 3;
    o_ref: (B, N) f32 in VMEM."""
    B, K = x_ref.shape

    def row(b):
        acc = wb_ref[K:K + 1, :]                      # bias with the +3 already folded in
        for k in range(K):                            # static unroll: K VPU FMAs, no MXU
            acc = acc + x_ref[b, k] * wb_ref[k:k + 1, :]
        # hardsigmoid-style epilogue: clamp to [0, 6], then multiply by 1/6
        return (jnp.clip(acc, 0.0, 6.0) * (1.0 / 6.0)).astype(o_ref.dtype)

    if B == 1:
        o_ref[...] = row(0)                           # single full-block store
    else:
        for b in range(B):                            # small static B only
            o_ref[b:b + 1, :] = row(b)


def prepare_params(weight, bias):
    """One-time setup: W^T (K, N) and (bias + 3) (1, N) merged into one (K+1, N) tile."""
    w_t = jnp.asarray(weight, jnp.float32).T                      # (K, N) = (3, 128)
    b3 = (jnp.asarray(bias, jnp.float32) + 3.0).reshape(1, -1)    # (1, N)
    return jnp.concatenate([w_t, b3], axis=0)                     # (K+1, N) = (4, 128)


def model_forward(x, wb):
    """x: (B, K) f32; wb: (K+1, N) f32 -> (B, N) f32."""
    B, _ = x.shape
    N = wb.shape[1]
    return pl.pallas_call(
        _linear_hsig_kernel,
        out_shape=jax.ShapeDtypeStruct((B, N), jnp.float32),
        in_specs=[
            pl.BlockSpec(memory_space=pltpu.MemorySpace.SMEM),   # x -> SMEM (scalar reads)
            pl.BlockSpec(memory_space=pltpu.MemorySpace.VMEM),   # [W^T ; bias+3] tile (4, 128)
        ],
        out_specs=pl.BlockSpec(memory_space=pltpu.MemorySpace.VMEM),
    )(x, wb)
    # TODO(synk): if B ever grows large, switch to a grid over batch tiles:
    # (TM, 128) output blocks with TM swept over 512/1024/2048, the K=3
    # contraction kept as 3 VPU FMAs per tile, x rows via scalar-prefetch, and
    # compiler_params=pltpu.CompilerParams(dimension_semantics=("parallel",))
    # so v7x's two TensorCores split the batch (no-op on v5e/v6e).


def reference_forward(x, weight, bias):
    o1 = x @ weight.T + bias
    return jnp.clip(o1 + 3.0, 0.0, 6.0) / 6.0


if __name__ == "__main__":
    key = jax.random.PRNGKey(0)
    kx, kw, kb = jax.random.split(key, 3)

    in_features, out_features = 3, 128
    B = 1

    # Deterministic parameter init (nn.Linear-style uniform(-1/sqrt(fan_in), 1/sqrt(fan_in)))
    bound = 1.0 / jnp.sqrt(jnp.float32(in_features))
    weight = jax.random.uniform(kw, (out_features, in_features),
                                minval=-bound, maxval=bound, dtype=jnp.float32)
    bias = jax.random.uniform(kb, (out_features,),
                              minval=-bound, maxval=bound, dtype=jnp.float32)
    x1 = jax.random.normal(kx, (B, in_features), dtype=jnp.float32)

    wb = prepare_params(weight, bias)   # one-time setup, not per forward call

    out = jax.block_until_ready(model_forward(x1, wb))
    ref = reference_forward(x1, weight, bias)

    assert out.shape == (B, out_features)
    assert jnp.allclose(out, ref, atol=1e-5, rtol=1e-5)

    print("KERNEL_OK")
</pallas_src>

<mosaic_0001>
module attributes {stable_mosaic.version = 11 : i64} {
  func.func @_linear_hsig_kernel(%arg0: memref<1x3xf32, #tpu.memory_space<smem>>, %arg1: memref<4x128xf32, #tpu.memory_space<vmem>>, %arg2: memref<1x128xf32, #tpu.memory_space<vmem>>) attributes {dimension_semantics = [], scalar_prefetch = 0 : i64, scratch_operands = 0 : i64, tpu.core_type = #tpu.core_type<tc>} {
    %c3 = arith.constant 3 : index
    %c0 = arith.constant 0 : index
    %0 = vector.load %arg1[%c3, %c0] : memref<4x128xf32, #tpu.memory_space<vmem>>, vector<1x128xf32>
    %c0_0 = arith.constant 0 : index
    %c0_1 = arith.constant 0 : index
    %1 = memref.load %arg0[%c0_0, %c0_1] : memref<1x3xf32, #tpu.memory_space<smem>>
    %c0_2 = arith.constant 0 : index
    %c0_3 = arith.constant 0 : index
    %2 = vector.load %arg1[%c0_2, %c0_3] : memref<4x128xf32, #tpu.memory_space<vmem>>, vector<1x128xf32>
    %3 = vector.broadcast %1 : f32 to vector<1x128xf32>
    %4 = arith.mulf %3, %2 : vector<1x128xf32>
    %5 = arith.addf %0, %4 : vector<1x128xf32>
    %c0_4 = arith.constant 0 : index
    %c1 = arith.constant 1 : index
    %6 = memref.load %arg0[%c0_4, %c1] : memref<1x3xf32, #tpu.memory_space<smem>>
    %c1_5 = arith.constant 1 : index
    %c0_6 = arith.constant 0 : index
    %7 = vector.load %arg1[%c1_5, %c0_6] : memref<4x128xf32, #tpu.memory_space<vmem>>, vector<1x128xf32>
    %8 = vector.broadcast %6 : f32 to vector<1x128xf32>
    %9 = arith.mulf %8, %7 : vector<1x128xf32>
    %10 = arith.addf %5, %9 : vector<1x128xf32>
    %c0_7 = arith.constant 0 : index
    %c2 = arith.constant 2 : index
    %11 = memref.load %arg0[%c0_7, %c2] : memref<1x3xf32, #tpu.memory_space<smem>>
    %c2_8 = arith.constant 2 : index
    %c0_9 = arith.constant 0 : index
    %12 = vector.load %arg1[%c2_8, %c0_9] : memref<4x128xf32, #tpu.memory_space<vmem>>, vector<1x128xf32>
    %13 = vector.broadcast %11 : f32 to vector<1x128xf32>
    %14 = arith.mulf %13, %12 : vector<1x128xf32>
    %15 = arith.addf %10, %14 : vector<1x128xf32>
    %cst = arith.constant 0.000000e+00 : f32
    %cst_10 = arith.constant 6.000000e+00 : f32
    %16 = vector.broadcast %cst : f32 to vector<1x128xf32>
    %17 = arith.maximumf %16, %15 : vector<1x128xf32>
    %18 = vector.broadcast %cst_10 : f32 to vector<1x128xf32>
    %19 = arith.minimumf %18, %17 : vector<1x128xf32>
    %cst_11 = arith.constant 0.166666672 : f32
    %20 = vector.broadcast %cst_11 : f32 to vector<1x128xf32>
    %21 = arith.mulf %19, %20 : vector<1x128xf32>
    %c0_12 = arith.constant 0 : index
    %c0_13 = arith.constant 0 : index
    %22 = vector.load %arg2[%c0_12, %c0_13] : memref<1x128xf32, #tpu.memory_space<vmem>>, vector<1x128xf32>
    tpu.vector_store %arg2[%c0_12, %c0_13], %21 {strides = array<i32>} : memref<1x128xf32, #tpu.memory_space<vmem>>, vector<1x128xf32>,
    return
  }
}

</mosaic_0001>

<bundles_post_ra>
// kernel: tpu_custom_call.1
= control target key start
LH: loop header
LB: loop body
LE: loop exit
PB: predicated region body
PF: predicated region fallthrough
CT: control target
= control target key end

     0   :  { %7 = vsyncpa [#allocation5], 0  ;;  %s175_s0 = inlined_call_operand.hbm [shape: f32[1,3], index: 0, kind: input, shape index: {}]   ;;  %s176_s1 = inlined_call_operand.hbm [shape: f32[4,128], index: 1, kind: input, shape index: {}]   ;;  %s177_s2 = inlined_call_operand.hbm [shape: f32[1,128], index: 2, kind: output, shape index: {}]  }
   0x1   :  { %8 = vsyncpa [#allocation3], 0 }
   0x2   :  { %9 = vsyncpa [#allocation4], 0  ;;  %s15_s11 = sshll.u32 %s175_s0, 4  ;;  %s24_s14 = sshll.u32 %s176_s1, 4  ;;  %s16_s11 = int_to_ptr.hbm [resolvable:$true] %s15_s11  ;;  %s25_s14 = int_to_ptr.hbm [resolvable:$true] %s24_s14 }
   0x3   :  { %s148_s15 = smov [#allocation2]   ;;  %s149_s16 = smov [#allocation6]  }
   0x4   :  { %18 = dma.hbm_to_smem %s16_s11, 16, %s148_s15, [#allocation5]  }
   0x5   :  { %s26_s17 = sshll.u32 %s149_s16, 4  ;;  %s27_s17 = int_to_ptr.vmem [resolvable:$true] %s26_s17 }
   0x6   :  { %29 = dma.hbm_to_vmem [thread:$0]  %s25_s14, 64, %s27_s17, [#allocation3]  }
   0x7   :  { %142 = dma.done.wait [#allocation5], 16  }
   0x8   :  { %143 = vsyncadd [#allocation5], 4294967280 }
   0x9   :  { %144 = dma.done.wait [#allocation3], 64  }
   0xa   :  { %145 = vsyncadd [#allocation3], 4294967232 }
   0xb   :  { %38 = sfence }
   0xc   :  { %s40_s18 = sld [smem:[#allocation2]]  ;;  %v41_v0 = vld [vmem:[#allocation6] sm:$0x1]  ;;  %v46_v1 = vld [vmem:[#allocation6 + $0x1] sm:$0x1]  ;;  %s150_s1 = smov [#allocation7]  }
   0xd   :  { %s77_s19 = sld [smem:[#allocation2 + $0x1]]  ;;  %v39_v2 = vld [vmem:[#allocation6 + $0x3] sm:$0x1]  ;;  %v51_v4 = vld [vmem:[#allocation6 + $0x2] sm:$0x1]  ;;  %s64_s20 = sshll.u32 %s150_s1, 4  ;;  %s65_s20 = int_to_ptr.vmem [resolvable:$true] %s64_s20 }
   0xe   :  { %s78_s0 = sld [smem:[#allocation2 + $0x2]]  ;;  %s66_s23 = sshll.u32 %s177_s2, 4  ;;  %s67_s23 = int_to_ptr.hbm [resolvable:$true] %s66_s23 }
  0x12   :  { %v42_v3 = vstv %s40_s18 }
  0x13   :  { %v43_v5 = vmul.f32 %v42_v3, %v41_v0  ;;  %v47_v6 = vstv %s77_s19 }
  0x14   :  { %v48_v7 = vmul.f32 %v47_v6, %v46_v1  ;;  %v52_v8 = vstv %s78_s0 }
  0x15   :  { %v44_v9 = vadd.f32 %v43_v5, %v39_v2  ;;  %v53_v10 = vmul.f32 %v52_v8, %v51_v4 }
  0x17   :  { %v49_v11 = vadd.f32 %v48_v7, %v44_v9 }
  0x19   :  { %v54_v12 = vadd.f32 %v53_v10, %v49_v11 }
  0x1b   :  { %v55_v13 = vmax.f32 %v54_v12, 0.0 }
  0x1d   :  { %v56_v14 = vmin.f32 %v55_v13, 6.0 }
  0x1f   :  { %v57_v15 = vmul.f32 0.16666667, %v56_v14 }
  0x21   :  { %58 = vst [vmem:[#allocation7] sm:$0x1] %v57_v15 }
  0x22   :  { %69 = dma.vmem_to_hbm [thread:$0]  %s65_s20, 16, %s67_s23, [#allocation4]  }
  0x23   :  { %146 = dma.done.wait [#allocation4], 16  }
  0x24   :  { %147 = vsyncadd [#allocation4], 4294967280 }
  0x25   :  { %74 = vsyncpa [#allocation3], 1 }
  0x26   :  { %75 = vsyncpa [#allocation4], 1 }
  0x27   :  { %76 = vsyncpa [#allocation5], 1 }

</bundles_post_ra>
